<compile_context>
chip_gen: v7x
topology: tpu7x:2x2x1
jax: 0.10.0
libtpu: 0.0.40
codegen_flags: <defaults>
</compile_context>

<pallas_src>
import functools

import jax
import jax.numpy as jnp
from jax.experimental import pallas as pl
from jax.experimental.pallas import tpu as pltpu


def _round_up(x, m):
    return ((x + m - 1) // m) * m


def _label_smoothing_kernel(x_ref, tgt_ref, out_ref, *, smoothing, confidence,
                            n_rows, n_classes, tm):
    i = pl.program_id(0)

    x = x_ref[...].astype(jnp.float32)                                    # (tm, C)
    tgt = tgt_ref[...]                                                    # (tm, 1)

    # Stable log-sum-exp pieces; never materialize full logprobs.
    m = jnp.max(x, axis=-1, keepdims=True)                                # (tm, 1)
    lse = jnp.log(jnp.sum(jnp.exp(x - m), axis=-1, keepdims=True))        # (tm, 1)

    # Gather x[row, target[row]] via a one-hot select (TPU-friendly gather).
    col = jax.lax.broadcasted_iota(jnp.int32, x.shape, 1)                 # (tm, C)
    x_t = jnp.sum(jnp.where(col == tgt, x, 0.0), axis=-1, keepdims=True)  # (tm, 1)
    sum_x = jnp.sum(x, axis=-1, keepdims=True)                            # (tm, 1)

    row_loss = (m + lse) - confidence * x_t - (smoothing / n_classes) * sum_x

    # Mask rows beyond the true batch (grid uses cdiv, last tile may overhang).
    row_id = i * tm + jax.lax.broadcasted_iota(jnp.int32, (tm, 1), 0)
    row_loss = jnp.where(row_id < n_rows, row_loss, 0.0)

    # One partial sum per tile, stored as a single dense (8, 128) vreg slab.
    tile_sum = jnp.sum(row_loss, axis=0, keepdims=True)                   # (1, 1)
    out_ref[...] = jnp.broadcast_to(tile_sum, out_ref.shape)


def _pick_tm(n_pad, c, itemsize):
    # ~8 MiB per logits block (double-buffered by the pipeline -> ~16 MiB),
    # comfortably inside the scoped-VMEM limit requested below on v5e/v6e/v7x.
    block_budget = 8 * 1024 * 1024
    tm = block_budget // max(1, c * itemsize)
    tm = (min(tm, 1024) // 8) * 8
    return max(8, min(tm, n_pad))


def label_smoothing_loss(x, target, smoothing=0.0, *, tm=None):
    """x: [N, C] float logits (f32 or bf16 -- no upcast needed), target: [N] int.
    Returns the scalar mean label-smoothed NLL loss (matches the torch module)."""
    confidence = 1.0 - float(smoothing)
    N, C = x.shape

    # Pad rows to a multiple of 8 so the (8, 128)-aligned block constraint holds
    # (no-op for typical batch sizes); padded rows are masked inside the kernel.
    n_pad = _round_up(N, 8)
    tgt2d = target.astype(jnp.int32).reshape(N, 1)
    if n_pad != N:
        x = jnp.pad(x, ((0, n_pad - N), (0, 0)))
        tgt2d = jnp.pad(tgt2d, ((0, n_pad - N), (0, 0)))

    if tm is None:
        tm = _pick_tm(n_pad, C, x.dtype.itemsize)
    tm = int(tm)
    num_tiles = -(-n_pad // tm)

    kernel = functools.partial(
        _label_smoothing_kernel,
        smoothing=float(smoothing),      # plain Python floats: no captured consts
        confidence=float(confidence),
        n_rows=int(N),
        n_classes=int(C),
        tm=tm,
    )

    partials = pl.pallas_call(
        kernel,
        out_shape=jax.ShapeDtypeStruct((num_tiles * 8, 128), jnp.float32),
        grid_spec=pltpu.PrefetchScalarGridSpec(
            num_scalar_prefetch=0,
            grid=(num_tiles,),
            in_specs=[
                pl.BlockSpec((tm, C), lambda i: (i, 0)),
                pl.BlockSpec((tm, 1), lambda i: (i, 0)),
            ],
            out_specs=pl.BlockSpec((8, 128), lambda i: (i, 0)),
        ),
        compiler_params=pltpu.CompilerParams(
            dimension_semantics=("parallel",),      # rows shard across TCs (v7x)
            vmem_limit_bytes=32 * 1024 * 1024,
        ),
    )(x, tgt2d)

    # One replicated partial sum per tile -> tiny glue reduction, then batch mean.
    total = jnp.sum(partials[::8, 0])
    return total / N


def _reference(x, target, smoothing):
    confidence = 1.0 - smoothing
    logprobs = jax.nn.log_softmax(x.astype(jnp.float32), axis=-1)
    nll = -jnp.take_along_axis(logprobs, target[:, None].astype(jnp.int32), axis=-1)[:, 0]
    smooth = -jnp.mean(logprobs, axis=-1)
    return jnp.mean(confidence * nll + smoothing * smooth)


if __name__ == "__main__":
    key = jax.random.PRNGKey(0)
    kx, kt = jax.random.split(key)

    N, C = 16, 128
    smoothing = 0.1
    x = jax.random.normal(kx, (N, C), dtype=jnp.float32)
    target = jax.random.randint(kt, (N,), 0, C, dtype=jnp.int32)

    loss = label_smoothing_loss(x, target, smoothing=smoothing)
    loss = jax.block_until_ready(loss)

    ref = _reference(x, target, smoothing)
    assert jnp.allclose(loss, ref, rtol=1e-5, atol=1e-5), (loss, ref)

    print("KERNEL_OK")
</pallas_src>

<mosaic_0001>
module attributes {stable_mosaic.version = 11 : i64} {
  func.func @_label_smoothing_kernel(%arg0: i32, %arg1: memref<16x128xf32, #tpu.memory_space<vmem>>, %arg2: memref<16x1xi32, #tpu.memory_space<vmem>>, %arg3: memref<8x128xf32, #tpu.memory_space<vmem>>) attributes {dimension_semantics = [#tpu.dimension_semantics<parallel>], iteration_bounds = array<i64: 1>, scalar_prefetch = 0 : i64, scratch_operands = 0 : i64, tpu.core_type = #tpu.core_type<tc>, window_params = [{transform_indices = @transform_0, window_bounds = array<i64: 16, 128>}, {transform_indices = @transform_1, window_bounds = array<i64: 16, 1>}, {transform_indices = @transform_2, window_bounds = array<i64: 8, 128>}]} {
    %c0 = arith.constant 0 : index
    %c0_0 = arith.constant 0 : index
    %0 = vector.load %arg1[%c0, %c0_0] : memref<16x128xf32, #tpu.memory_space<vmem>>, vector<16x128xf32>
    %c0_1 = arith.constant 0 : index
    %c0_2 = arith.constant 0 : index
    %1 = vector.load %arg2[%c0_1, %c0_2] : memref<16x1xi32, #tpu.memory_space<vmem>>, vector<16x1xi32>
    %cst = arith.constant dense<0xFF800000> : vector<16xf32>
    %2 = vector.multi_reduction <maximumf>, %0, %cst [1] : vector<16x128xf32> to vector<16xf32>
    %3 = vector.shape_cast %2 : vector<16xf32> to vector<16x1xf32>
    %4 = vector.broadcast %3 : vector<16x1xf32> to vector<16x128xf32>
    %5 = arith.subf %0, %4 : vector<16x128xf32>
    %6 = math.exp %5 : vector<16x128xf32>
    %cst_3 = arith.constant dense<0.000000e+00> : vector<16xf32>
    %7 = vector.multi_reduction <add>, %6, %cst_3 [1] : vector<16x128xf32> to vector<16xf32>
    %8 = vector.shape_cast %7 : vector<16xf32> to vector<16x1xf32>
    %9 = math.log %8 : vector<16x1xf32>
    %10 = tpu.iota {dimensions = array<i32: 1>} : vector<16x128xi32>
    %11 = vector.broadcast %1 : vector<16x1xi32> to vector<16x128xi32>
    %12 = arith.cmpi eq, %10, %11 : vector<16x128xi32>
    %cst_4 = arith.constant 0.000000e+00 : f32
    %13 = vector.broadcast %cst_4 : f32 to vector<16x128xf32>
    %14 = arith.select %12, %0, %13 : vector<16x128xi1>, vector<16x128xf32>
    %cst_5 = arith.constant dense<0.000000e+00> : vector<16xf32>
    %15 = vector.multi_reduction <add>, %14, %cst_5 [1] : vector<16x128xf32> to vector<16xf32>
    %16 = vector.shape_cast %15 : vector<16xf32> to vector<16x1xf32>
    %cst_6 = arith.constant dense<0.000000e+00> : vector<16xf32>
    %17 = vector.multi_reduction <add>, %0, %cst_6 [1] : vector<16x128xf32> to vector<16xf32>
    %18 = vector.shape_cast %17 : vector<16xf32> to vector<16x1xf32>
    %19 = arith.addf %3, %9 : vector<16x1xf32>
    %cst_7 = arith.constant 0.899999976 : f32
    %20 = vector.broadcast %cst_7 : f32 to vector<16x1xf32>
    %21 = arith.mulf %20, %16 : vector<16x1xf32>
    %22 = arith.subf %19, %21 : vector<16x1xf32>
    %cst_8 = arith.constant 7.812500e-04 : f32
    %23 = vector.broadcast %cst_8 : f32 to vector<16x1xf32>
    %24 = arith.mulf %23, %18 : vector<16x1xf32>
    %25 = arith.subf %22, %24 : vector<16x1xf32>
    %c16_i32 = arith.constant 16 : i32
    %26 = arith.muli %arg0, %c16_i32 : i32
    %27 = tpu.iota {dimensions = array<i32: 0>} : vector<16x1xi32>
    %28 = vector.broadcast %26 : i32 to vector<16x1xi32>
    %29 = arith.addi %28, %27 : vector<16x1xi32>
    %c16_i32_9 = arith.constant 16 : i32
    %30 = vector.broadcast %c16_i32_9 : i32 to vector<16x1xi32>
    %31 = arith.cmpi slt, %29, %30 : vector<16x1xi32>
    %cst_10 = arith.constant 0.000000e+00 : f32
    %32 = vector.broadcast %cst_10 : f32 to vector<16x1xf32>
    %33 = arith.select %31, %25, %32 : vector<16x1xi1>, vector<16x1xf32>
    %cst_11 = arith.constant dense<0.000000e+00> : vector<1xf32>
    %34 = vector.multi_reduction <add>, %33, %cst_11 [0] : vector<16x1xf32> to vector<1xf32>
    %35 = vector.shape_cast %34 : vector<1xf32> to vector<1x1xf32>
    %36 = vector.shape_cast %35 : vector<1x1xf32> to vector<1x1xf32>
    %37 = vector.broadcast %36 : vector<1x1xf32> to vector<8x128xf32>
    %c0_12 = arith.constant 0 : index
    %c0_13 = arith.constant 0 : index
    %38 = vector.load %arg3[%c0_12, %c0_13] : memref<8x128xf32, #tpu.memory_space<vmem>>, vector<8x128xf32>
    tpu.vector_store %arg3[%c0_12, %c0_13], %37 {strides = array<i32>} : memref<8x128xf32, #tpu.memory_space<vmem>>, vector<8x128xf32>,
    return
  }
  func.func @transform_0(%arg0: i32) -> (i32, i32) {
    %c0_i32 = arith.constant 0 : i32
    %c0_i32_0 = arith.constant 0 : i32
    return %arg0, %c0_i32 : i32, i32
  }
  func.func @transform_1(%arg0: i32) -> (i32, i32) {
    %c0_i32 = arith.constant 0 : i32
    %c0_i32_0 = arith.constant 0 : i32
    return %arg0, %c0_i32 : i32, i32
  }
  func.func @transform_2(%arg0: i32) -> (i32, i32) {
    %c0_i32 = arith.constant 0 : i32
    %c0_i32_0 = arith.constant 0 : i32
    return %arg0, %c0_i32 : i32, i32
  }
}

</mosaic_0001>

<bundles_post_ra>
// kernel: tpu_custom_call.1
= control target key start
LH: loop header
LB: loop body
LE: loop exit
PB: predicated region body
PF: predicated region fallthrough
CT: control target
= control target key end

     0   :  { %v133_v2 = vmov 0   ;;  %s174_s0 = inlined_call_operand.vmem [shape: f32[16,128], index: 0, kind: input, shape index: {}]   ;;  %s175_s1 = inlined_call_operand.vmem [shape: s32[16,1], index: 1, kind: input, shape index: {}]   ;;  %s176_s2 = inlined_call_operand.hbm [shape: f32[8,128], index: 2, kind: output, shape index: {}]  }
   0x1   :  { %v12_v0 = vld [vmem:[%s174_s0] sm:$0xff]  ;;  %99 = vset.pattern.permute.xlu1 %v133_v2 }
   0x2   :  { %v14_v1 = vld [vmem:[%s175_s1] sm:$0xff]  ;;  %16 = vmax.xlane.f32.xlu0 %v12_v0 }
   0x3   :  { %7 = vsyncpa [#allocation3], 0  ;;  %v13_v3 = vld [vmem:[%s174_s0 + $0x8] sm:$0xff]  ;;  %37 = vperm.xlu1 %99, %v14_v1   ;;  %100 = vset.pattern.permute.xlu0 %v133_v2  ;;  %v34_v10 = vlaneseq  ;;  %s134_s0 = smov [#allocation2]  }
   0x4   :  { %v15_v4 = vld [vmem:[%s175_s1 + $0x8] sm:$0xff]  ;;  %s89_s1 = sshll.u32 %s134_s0, 4  ;;  %s90_s1 = int_to_ptr.vmem [resolvable:$true] %s89_s1 }
   0x5   :  { %v35_v13 = vand.u32 127, %v34_v10  ;;  %s109_s17 = scalar_lea.vmem %s90_s1, 128  ;;  %p114_p1 = scmp.lt.s32.totalorder %s90_s1, %s90_s1 }
   0x6   :  { %18 = vmax.xlane.f32.xlu0 %v13_v3  ;;  %p110_p0 = scmp.ne.s32.totalorder %s90_s1, %s109_s17  ;;  %p115_p2 = scmp.lt.s32.totalorder %s109_s17, %s109_s17 }
   0x7   :  { %40 = vperm.xlu1 %99, %v15_v4  }
   0x8   :  { %p116_p3 = por %p115_p2, %p114_p1 }
   0xa   :  { %p117_p4 = pnand %p116_p3, %p110_p0 }
  0x82   :  { %v38_v12 = vpop.permute.xlu1 %37 }
  0x83   :  { %vm42_vm0 = vcmp.eq.s32.totalorder %v35_v13, %v38_v12 }
  0x84   :  { %v44_v16 = vsel %vm42_vm0, %v12_v0, 0.0 }
  0x86   :  { %v41_v15 = vpop.permute.xlu1 %40 }
  0x87   :  { %vm43_vm1 = vcmp.eq.s32.totalorder %v35_v13, %v41_v15 }
  0x88   :  { %v45_v18 = vsel %vm43_vm1, %v13_v3, 0.0 }
  0x8f   :  { %v17_v5 = vpop.xlane.xlu0 %16 }
  0x90   :  { %v20_v6 = vsub.f32 %v12_v0, %v17_v5 }
  0x92   :  { %v22_v7 = vmul.f32 1.442695, %v20_v6 }
  0x93   :  { %v19_v8 = vpop.xlane.xlu0 %18 }
  0x94   :  { %101 = vpow2.f32 %v22_v7  ;;  %v21_v9 = vsub.f32 %v13_v3, %v19_v8 }
  0x96   :  { %v24_v11 = vmul.f32 1.442695, %v21_v9 }
  0x98   :  { %103 = vpow2.f32 %v24_v11 }
  0x9e   :  { %v102_v14 = vpop.eup %101 }
  0x9f   :  { %26 = vadd.xlane.f32.xlu0 %v102_v14 }
  0xa2   :  { %v104_v17 = vpop.eup %103 }
  0xa3   :  { %28 = vadd.xlane.f32.xlu1 %v104_v17  ;;  %46 = vadd.xlane.f32.xlu0 %v44_v16 }
  0xa7   :  { %48 = vadd.xlane.f32.xlu0 %v45_v18 }
  0xab   :  { %50 = vadd.xlane.f32.xlu0 %v12_v0 }
  0xaf   :  { %52 = vadd.xlane.f32.xlu0 %v13_v3 }
 0x12c   :  { %v27_v19 = vpop.xlane.xlu0 %26 }
 0x12d   :  { %105 = vlog2.f32 %v27_v19 }
 0x130   :  { %v29_v20 = vpop.xlane.xlu1 %28  ;;  %v47_v21 = vpop.xlane.xlu0 %46 }
 0x131   :  { %107 = vlog2.f32 %v29_v20  ;;  %v56_v29 = vmul.f32 0.9, %v47_v21 }
 0x134   :  { %v49_v22 = vpop.xlane.xlu0 %48 }
 0x135   :  { %v57_v31 = vmul.f32 0.9, %v49_v22 }
 0x137   :  { %v106_v23 = vpop.eup %105 }
 0x138   :  { %v31_v24 = vmul.f32 0.6931472, %v106_v23  ;;  %v51_v25 = vpop.xlane.xlu0 %50 }
 0x139   :  { %v60_v34 = vmul.f32 0.00078125, %v51_v25 }
 0x13a   :  { %v54_v26 = vadd.f32 %v31_v24, %v17_v5 }
 0x13b   :  { %v108_v27 = vpop.eup %107 }
 0x13c   :  { %v33_v28 = vmul.f32 0.6931472, %v108_v27  ;;  %v53_v30 = vpop.xlane.xlu0 %52  ;;  %v58_v32 = vsub.f32 %v54_v26, %v56_v29 }
 0x13d   :  { %v61_v35 = vmul.f32 0.00078125, %v53_v30 }
 0x13e   :  { %v55_v33 = vadd.f32 %v33_v28, %v19_v8  ;;  %v62_v37 = vsub.f32 %v58_v32, %v60_v34 }
 0x140   :  { %v59_v36 = vsub.f32 %v55_v33, %v57_v31 }
 0x142   :  { %v63_v38 = vsub.f32 %v59_v36, %v61_v35 }
 0x144   :  { %v75_v39 = vadd.f32 %v63_v38, %v62_v37 }
 0x146   :  { %v76_v40 = vrot.slane %v75_v39, 4 }
 0x148   :  { %v77_v41 = vadd.f32 %v76_v40, %v75_v39 }
 0x14a   :  { %v78_v42 = vrot.slane %v77_v41, 2 }
 0x14c   :  { %v79_v43 = vadd.f32 %v78_v42, %v77_v41 }
 0x14e   :  { %v80_v44 = vrot.slane %v79_v43, 1 }
 0x150   :  { %v81_v45 = vadd.f32 %v80_v44, %v79_v43 }
 0x152   :  { %82 = vst [vmem:[#allocation2] sm:$0xff] %v81_v45 }
 0x153   :  { %120 = shalt.err (!%p117_p4)
}
 0x154   :  { %s121_s20 = scalar_lea.hbm %s176_s2, 128 }
 0x155   :  { %p122_p5 = scmp.ne.s32.totalorder %s176_s2, %s121_s20  ;;  %p125_p6 = scmp.lt.u32.totalorder %s121_s20, %s176_s2 }
 0x157   :  { %p127_p7 = pnand %p125_p6, %p122_p5 }
 0x159   :  { %130 = shalt.err (!%p127_p7)
}
 0x15a   :  { %92 = dma.vmem_to_hbm [thread:$0]  %s90_s1, 128, %s176_s2, [#allocation3]  }
 0x15b   :  { %131 = dma.done.wait [#allocation3], 128  }
 0x15c   :  { %132 = vsyncadd [#allocation3], 4294967168 }
 0x15d   :  { %96 = vsyncpa [#allocation3], 1 }

</bundles_post_ra>
